<compile_context>
chip_gen: v7x
topology: tpu7x:2x2x1
jax: 0.10.0
libtpu: 0.0.40
codegen_flags: <defaults>
</compile_context>

<pallas_src>
import jax
import jax.numpy as jnp
from jax import lax
from jax.experimental import pallas as pl
from jax.experimental.pallas import tpu as pltpu
import numpy as np

IGNORE_LABEL = -1
THRESH = 0.9
MIN_KEPT = max(1, 131072)
# class weights from the PyTorch module, baked into the kernel as constants
CLASS_WEIGHT = (1.1405, 0.9311, 1.0038, 1.1941, 1.0039, 0.8566)
NUM_CLASSES = len(CLASS_WEIGHT)

LANE = 128        # lanes per vreg row
SUB = 8           # f32 sublanes per vreg
S_TARGET = 1024   # sublane rows per grid step -> 131072 pixels / step


def _round_up(x, m):
    return ((x + m - 1) // m) * m


def _per_pixel_kernel(score_ref, tgt_ref, loss_ref, pred_ref):
    """One (batch, pixel-tile) step.

    score_ref: (1, C, S_T, 128) f32 logits  (pixels dense on sublanes+lanes)
    tgt_ref:   (1, 1, S_T, 128) i32 labels
    loss_ref:  (1, 1, S_T, 128) f32 weighted CE loss (0 at ignore pixels)
    pred_ref:  (1, 1, S_T, 128) f32 softmax prob of the target class
    """
    tgt = tgt_ref[0, 0]                              # (S_T, 128) i32
    ignore = tgt == IGNORE_LABEL
    tmp_tgt = jnp.where(ignore, 0, tgt)              # ignore -> class 0 (as torch)

    # channel max -- unrolled, pure VPU (no XLU cross-sublane reductions)
    m = score_ref[0, 0]
    for c in range(1, NUM_CLASSES):
        m = jnp.maximum(m, score_ref[0, c])

    # exp-sum + target gather + class weight, fused into one unrolled loop
    s = jnp.zeros_like(m)
    z_t = jnp.zeros_like(m)
    e_t = jnp.zeros_like(m)
    w_t = jnp.zeros_like(m)
    for c in range(NUM_CLASSES):
        z_c = score_ref[0, c] - m
        e_c = jnp.exp(z_c)
        s = s + e_c
        sel = tmp_tgt == c
        z_t = jnp.where(sel, z_c, z_t)
        e_t = jnp.where(sel, e_c, e_t)
        w_t = jnp.where(sel, jnp.float32(CLASS_WEIGHT[c]), w_t)

    logp_t = z_t - jnp.log(s)          # log softmax of the target class
    pred_t = e_t / s                   # softmax prob; reuses exp(z_t), no 2nd exp

    loss = jnp.where(ignore, jnp.float32(0.0), -w_t * logp_t)

    loss_ref[0, 0] = loss
    pred_ref[0, 0] = pred_t


@jax.jit
def ohem_cross_entropy(score, target):
    """score: (N, C, H, W) float32 logits (NCHW, as in PyTorch);
       target: (N, H, W) int labels in [0, C) or IGNORE_LABEL.
       Returns ohem_mean + per-pixel loss, shape (N*H*W,)."""
    N, C, H, W = score.shape
    assert C == NUM_CLASSES, "class count must match the weight vector"
    # TODO(synk): F.upsample(bilinear) path when score spatial != target spatial
    # is not implemented; inputs are assumed to already match.

    HW = H * W
    S = -(-HW // LANE)                       # sublane rows needed
    if S <= S_TARGET:
        S_T = S                              # full-dim block (always legal)
    else:
        S = _round_up(S, SUB)                # guarantee a multiple-of-8 tile
        S_T = next(d for d in range(S_TARGET, SUB - 1, -SUB) if S % d == 0)
    HW_pad = S * LANE
    pad = HW_pad - HW
    n_tiles = S // S_T

    score3 = score.reshape(N, C, HW)
    tgt2 = target.reshape(N, HW).astype(jnp.int32)
    if pad:
        # Only hit when H*W is not a multiple of 128 (rare for segmentation);
        # padded pixels get IGNORE_LABEL so they never enter threshold / mean.
        score3 = jnp.pad(score3, ((0, 0), (0, 0), (0, pad)))
        tgt2 = jnp.pad(tgt2, ((0, 0), (0, pad)), constant_values=IGNORE_LABEL)
    score4 = score3.reshape(N, C, S, LANE)   # pure view of NCHW when pad == 0
    tgt4 = tgt2.reshape(N, 1, S, LANE)

    # ---- Pallas kernel: per-pixel weighted CE + target-class probability ----
    loss4, pred4 = pl.pallas_call(
        _per_pixel_kernel,
        out_shape=(jax.ShapeDtypeStruct((N, 1, S, LANE), jnp.float32),
                   jax.ShapeDtypeStruct((N, 1, S, LANE), jnp.float32)),
        grid=(N, n_tiles),
        in_specs=[pl.BlockSpec((1, C, S_T, LANE), lambda n, j: (n, 0, j, 0)),
                  pl.BlockSpec((1, 1, S_T, LANE), lambda n, j: (n, 0, j, 0))],
        out_specs=(pl.BlockSpec((1, 1, S_T, LANE), lambda n, j: (n, 0, j, 0)),
                   pl.BlockSpec((1, 1, S_T, LANE), lambda n, j: (n, 0, j, 0))),
        compiler_params=pltpu.CompilerParams(
            dimension_semantics=("parallel", "parallel"),
            vmem_limit_bytes=32 * 1024 * 1024),
    )(score4, tgt4)

    # ---- OHEM threshold + hard-pixel mean (streaming XLA reduces) ----------
    # Padded pixels are invalid (IGNORE) and their loss is 0, so they never
    # affect the threshold, the hard mask, or the sums -- no slicing needed.
    valid = (tgt2 != IGNORE_LABEL).reshape(-1)
    pred_flat = pred4.reshape(-1)
    loss_flat = loss4.reshape(-1)

    n_valid = jnp.sum(valid.astype(jnp.int32))
    k_idx = jnp.maximum(jnp.minimum(jnp.int32(MIN_KEPT), n_valid - 1), 0)
    rank = k_idx + 1                                   # 1-indexed rank
    thresh_f = jnp.float32(THRESH)

    # Exact k-th smallest valid pred WITHOUT sort / top_k:
    #  * if >= rank valid preds are <= 0.9, threshold is exactly 0.9 and the
    #    order statistic is irrelevant (max(min_value, 0.9) == 0.9);
    #  * otherwise bisect on the f32 bit pattern (order-isomorphic for >= 0
    #    values): 31 streaming count passes, exact even with ties.
    cnt_le_thresh = jnp.sum(
        jnp.logical_and(valid, pred_flat <= thresh_f).astype(jnp.int32))
    bits = lax.bitcast_convert_type(pred_flat, jnp.int32)
    big_bits = lax.bitcast_convert_type(jnp.float32(2.0), jnp.int32)
    bits = jnp.where(valid, bits, big_bits)            # invalid sorts last
    one_bits = lax.bitcast_convert_type(jnp.float32(1.0), jnp.int32)

    def _kth_smallest():
        def body(_, lo_hi):
            lo, hi = lo_hi
            mid = (lo + hi) // 2
            ok = jnp.sum((bits <= mid).astype(jnp.int32)) >= rank
            return jnp.where(ok, lo, mid + 1), jnp.where(ok, mid, hi)
        lo, _ = lax.fori_loop(0, 31, body, (jnp.int32(0), one_bits))
        return lax.bitcast_convert_type(lo, jnp.float32)

    min_value = lax.cond(cnt_le_thresh >= rank, lambda: thresh_f, _kth_smallest)
    threshold = jnp.maximum(min_value, thresh_f)

    hard = jnp.logical_and(valid, pred_flat < threshold)
    hard_sum = jnp.sum(jnp.where(hard, loss_flat, jnp.float32(0.0)))
    hard_cnt = jnp.sum(hard.astype(jnp.float32))
    # NOTE: like the PyTorch original, this is NaN if no hard pixel exists.
    ohem_mean = hard_sum / hard_cnt

    if pad:
        loss_out = loss4.reshape(N, HW_pad)[:, :HW].reshape(-1)
    else:
        loss_out = loss_flat
    return ohem_mean + loss_out                        # shape (N*H*W,)


def _reference(score, target):
    """Pure-JAX reference of the PyTorch forward."""
    N, C, H, W = score.shape
    w = jnp.asarray(CLASS_WEIGHT, jnp.float32)
    logp = jax.nn.log_softmax(score, axis=1)
    p = jnp.exp(logp)
    tflat = target.reshape(-1)
    valid = tflat != IGNORE_LABEL
    tmp = jnp.where(valid, tflat, 0)
    logp_pc = jnp.transpose(logp, (0, 2, 3, 1)).reshape(-1, C)
    p_pc = jnp.transpose(p, (0, 2, 3, 1)).reshape(-1, C)
    logp_t = jnp.take_along_axis(logp_pc, tmp[:, None], axis=1)[:, 0]
    p_t = jnp.take_along_axis(p_pc, tmp[:, None], axis=1)[:, 0]
    w_t = w[tmp]
    pix_loss = jnp.where(valid, -w_t * logp_t, 0.0)
    n_valid = jnp.sum(valid.astype(jnp.int32))
    sorted_pred = jnp.sort(jnp.where(valid, p_t, jnp.inf))
    k = jnp.minimum(jnp.int32(MIN_KEPT), n_valid - 1)
    thr = jnp.maximum(jnp.take(sorted_pred, k), jnp.float32(THRESH))
    hard = jnp.logical_and(valid, p_t < thr)
    mean = jnp.sum(jnp.where(hard, pix_loss, 0.0)) / jnp.sum(hard.astype(jnp.float32))
    return mean + pix_loss


if __name__ == "__main__":
    key = jax.random.PRNGKey(0)
    k1, k2 = jax.random.split(key)
    N, C, H, W = 2, 6, 16, 16
    score = jax.random.normal(k1, (N, C, H, W), dtype=jnp.float32)
    # labels in [-1, C): includes the ignore label -1
    target = jax.random.randint(k2, (N, H, W), -1, C).astype(jnp.int32)

    out = jax.block_until_ready(ohem_cross_entropy(score, target))
    assert out.shape == (N * H * W,)

    ref = jax.block_until_ready(_reference(score, target))
    np.testing.assert_allclose(np.asarray(out), np.asarray(ref),
                               rtol=1e-4, atol=1e-4)
    print("KERNEL_OK")
</pallas_src>

<mosaic_0001>
module attributes {stable_mosaic.version = 11 : i64} {
  func.func @_per_pixel_kernel(%arg0: i32, %arg1: i32, %arg2: memref<1x6x2x128xf32, #tpu.memory_space<vmem>>, %arg3: memref<1x1x2x128xi32, #tpu.memory_space<vmem>>, %arg4: memref<1x1x2x128xf32, #tpu.memory_space<vmem>>, %arg5: memref<1x1x2x128xf32, #tpu.memory_space<vmem>>) attributes {dimension_semantics = [#tpu.dimension_semantics<parallel>, #tpu.dimension_semantics<parallel>], iteration_bounds = array<i64: 2, 1>, scalar_prefetch = 0 : i64, scratch_operands = 0 : i64, tpu.core_type = #tpu.core_type<tc>, window_params = [{transform_indices = @transform_0, window_bounds = array<i64: 1, 6, 2, 128>}, {transform_indices = @transform_1, window_bounds = array<i64: 1, 1, 2, 128>}, {transform_indices = @transform_2, window_bounds = array<i64: 1, 1, 2, 128>}, {transform_indices = @transform_3, window_bounds = array<i64: 1, 1, 2, 128>}]} {
    %c0 = arith.constant 0 : index
    %c0_0 = arith.constant 0 : index
    %c0_1 = arith.constant 0 : index
    %c0_2 = arith.constant 0 : index
    %0 = vector.load %arg3[%c0, %c0_0, %c0_1, %c0_2] : memref<1x1x2x128xi32, #tpu.memory_space<vmem>>, vector<1x1x2x128xi32>
    %1 = vector.shape_cast %0 : vector<1x1x2x128xi32> to vector<2x128xi32>
    %c-1_i32 = arith.constant -1 : i32
    %2 = vector.broadcast %c-1_i32 : i32 to vector<2x128xi32>
    %3 = arith.cmpi eq, %1, %2 : vector<2x128xi32>
    %c0_i32 = arith.constant 0 : i32
    %4 = vector.broadcast %c0_i32 : i32 to vector<2x128xi32>
    %5 = arith.select %3, %4, %1 : vector<2x128xi1>, vector<2x128xi32>
    %c0_3 = arith.constant 0 : index
    %c0_4 = arith.constant 0 : index
    %c0_5 = arith.constant 0 : index
    %c0_6 = arith.constant 0 : index
    %6 = vector.load %arg2[%c0_3, %c0_4, %c0_5, %c0_6] : memref<1x6x2x128xf32, #tpu.memory_space<vmem>>, vector<1x1x2x128xf32>
    %7 = vector.shape_cast %6 : vector<1x1x2x128xf32> to vector<2x128xf32>
    %c0_7 = arith.constant 0 : index
    %c1 = arith.constant 1 : index
    %c0_8 = arith.constant 0 : index
    %c0_9 = arith.constant 0 : index
    %8 = vector.load %arg2[%c0_7, %c1, %c0_8, %c0_9] : memref<1x6x2x128xf32, #tpu.memory_space<vmem>>, vector<1x1x2x128xf32>
    %9 = vector.shape_cast %8 : vector<1x1x2x128xf32> to vector<2x128xf32>
    %10 = arith.maximumf %7, %9 : vector<2x128xf32>
    %c0_10 = arith.constant 0 : index
    %c2 = arith.constant 2 : index
    %c0_11 = arith.constant 0 : index
    %c0_12 = arith.constant 0 : index
    %11 = vector.load %arg2[%c0_10, %c2, %c0_11, %c0_12] : memref<1x6x2x128xf32, #tpu.memory_space<vmem>>, vector<1x1x2x128xf32>
    %12 = vector.shape_cast %11 : vector<1x1x2x128xf32> to vector<2x128xf32>
    %13 = arith.maximumf %10, %12 : vector<2x128xf32>
    %c0_13 = arith.constant 0 : index
    %c3 = arith.constant 3 : index
    %c0_14 = arith.constant 0 : index
    %c0_15 = arith.constant 0 : index
    %14 = vector.load %arg2[%c0_13, %c3, %c0_14, %c0_15] : memref<1x6x2x128xf32, #tpu.memory_space<vmem>>, vector<1x1x2x128xf32>
    %15 = vector.shape_cast %14 : vector<1x1x2x128xf32> to vector<2x128xf32>
    %16 = arith.maximumf %13, %15 : vector<2x128xf32>
    %c0_16 = arith.constant 0 : index
    %c4 = arith.constant 4 : index
    %c0_17 = arith.constant 0 : index
    %c0_18 = arith.constant 0 : index
    %17 = vector.load %arg2[%c0_16, %c4, %c0_17, %c0_18] : memref<1x6x2x128xf32, #tpu.memory_space<vmem>>, vector<1x1x2x128xf32>
    %18 = vector.shape_cast %17 : vector<1x1x2x128xf32> to vector<2x128xf32>
    %19 = arith.maximumf %16, %18 : vector<2x128xf32>
    %c0_19 = arith.constant 0 : index
    %c5 = arith.constant 5 : index
    %c0_20 = arith.constant 0 : index
    %c0_21 = arith.constant 0 : index
    %20 = vector.load %arg2[%c0_19, %c5, %c0_20, %c0_21] : memref<1x6x2x128xf32, #tpu.memory_space<vmem>>, vector<1x1x2x128xf32>
    %21 = vector.shape_cast %20 : vector<1x1x2x128xf32> to vector<2x128xf32>
    %22 = arith.maximumf %19, %21 : vector<2x128xf32>
    %cst = arith.constant 0.000000e+00 : f32
    %23 = vector.broadcast %cst : f32 to vector<2x128xf32>
    %cst_22 = arith.constant 0.000000e+00 : f32
    %24 = vector.broadcast %cst_22 : f32 to vector<2x128xf32>
    %cst_23 = arith.constant 0.000000e+00 : f32
    %25 = vector.broadcast %cst_23 : f32 to vector<2x128xf32>
    %cst_24 = arith.constant 0.000000e+00 : f32
    %26 = vector.broadcast %cst_24 : f32 to vector<2x128xf32>
    %c0_25 = arith.constant 0 : index
    %c0_26 = arith.constant 0 : index
    %c0_27 = arith.constant 0 : index
    %c0_28 = arith.constant 0 : index
    %27 = vector.load %arg2[%c0_25, %c0_26, %c0_27, %c0_28] : memref<1x6x2x128xf32, #tpu.memory_space<vmem>>, vector<1x1x2x128xf32>
    %28 = vector.shape_cast %27 : vector<1x1x2x128xf32> to vector<2x128xf32>
    %29 = arith.subf %28, %22 : vector<2x128xf32>
    %30 = math.exp %29 : vector<2x128xf32>
    %31 = arith.addf %23, %30 : vector<2x128xf32>
    %c0_i32_29 = arith.constant 0 : i32
    %32 = vector.broadcast %c0_i32_29 : i32 to vector<2x128xi32>
    %33 = arith.cmpi eq, %5, %32 : vector<2x128xi32>
    %34 = arith.select %33, %29, %24 : vector<2x128xi1>, vector<2x128xf32>
    %35 = arith.select %33, %30, %25 : vector<2x128xi1>, vector<2x128xf32>
    %cst_30 = arith.constant 1.140500e+00 : f32
    %36 = vector.broadcast %cst_30 : f32 to vector<2x128xf32>
    %37 = arith.select %33, %36, %26 : vector<2x128xi1>, vector<2x128xf32>
    %c0_31 = arith.constant 0 : index
    %c1_32 = arith.constant 1 : index
    %c0_33 = arith.constant 0 : index
    %c0_34 = arith.constant 0 : index
    %38 = vector.load %arg2[%c0_31, %c1_32, %c0_33, %c0_34] : memref<1x6x2x128xf32, #tpu.memory_space<vmem>>, vector<1x1x2x128xf32>
    %39 = vector.shape_cast %38 : vector<1x1x2x128xf32> to vector<2x128xf32>
    %40 = arith.subf %39, %22 : vector<2x128xf32>
    %41 = math.exp %40 : vector<2x128xf32>
    %42 = arith.addf %31, %41 : vector<2x128xf32>
    %c1_i32 = arith.constant 1 : i32
    %43 = vector.broadcast %c1_i32 : i32 to vector<2x128xi32>
    %44 = arith.cmpi eq, %5, %43 : vector<2x128xi32>
    %45 = arith.select %44, %40, %34 : vector<2x128xi1>, vector<2x128xf32>
    %46 = arith.select %44, %41, %35 : vector<2x128xi1>, vector<2x128xf32>
    %cst_35 = arith.constant 9.311000e-01 : f32
    %47 = vector.broadcast %cst_35 : f32 to vector<2x128xf32>
    %48 = arith.select %44, %47, %37 : vector<2x128xi1>, vector<2x128xf32>
    %c0_36 = arith.constant 0 : index
    %c2_37 = arith.constant 2 : index
    %c0_38 = arith.constant 0 : index
    %c0_39 = arith.constant 0 : index
    %49 = vector.load %arg2[%c0_36, %c2_37, %c0_38, %c0_39] : memref<1x6x2x128xf32, #tpu.memory_space<vmem>>, vector<1x1x2x128xf32>
    %50 = vector.shape_cast %49 : vector<1x1x2x128xf32> to vector<2x128xf32>
    %51 = arith.subf %50, %22 : vector<2x128xf32>
    %52 = math.exp %51 : vector<2x128xf32>
    %53 = arith.addf %42, %52 : vector<2x128xf32>
    %c2_i32 = arith.constant 2 : i32
    %54 = vector.broadcast %c2_i32 : i32 to vector<2x128xi32>
    %55 = arith.cmpi eq, %5, %54 : vector<2x128xi32>
    %56 = arith.select %55, %51, %45 : vector<2x128xi1>, vector<2x128xf32>
    %57 = arith.select %55, %52, %46 : vector<2x128xi1>, vector<2x128xf32>
    %cst_40 = arith.constant 1.003800e+00 : f32
    %58 = vector.broadcast %cst_40 : f32 to vector<2x128xf32>
    %59 = arith.select %55, %58, %48 : vector<2x128xi1>, vector<2x128xf32>
    %c0_41 = arith.constant 0 : index
    %c3_42 = arith.constant 3 : index
    %c0_43 = arith.constant 0 : index
    %c0_44 = arith.constant 0 : index
    %60 = vector.load %arg2[%c0_41, %c3_42, %c0_43, %c0_44] : memref<1x6x2x128xf32, #tpu.memory_space<vmem>>, vector<1x1x2x128xf32>
    %61 = vector.shape_cast %60 : vector<1x1x2x128xf32> to vector<2x128xf32>
    %62 = arith.subf %61, %22 : vector<2x128xf32>
    %63 = math.exp %62 : vector<2x128xf32>
    %64 = arith.addf %53, %63 : vector<2x128xf32>
    %c3_i32 = arith.constant 3 : i32
    %65 = vector.broadcast %c3_i32 : i32 to vector<2x128xi32>
    %66 = arith.cmpi eq, %5, %65 : vector<2x128xi32>
    %67 = arith.select %66, %62, %56 : vector<2x128xi1>, vector<2x128xf32>
    %68 = arith.select %66, %63, %57 : vector<2x128xi1>, vector<2x128xf32>
    %cst_45 = arith.constant 1.194100e+00 : f32
    %69 = vector.broadcast %cst_45 : f32 to vector<2x128xf32>
    %70 = arith.select %66, %69, %59 : vector<2x128xi1>, vector<2x128xf32>
    %c0_46 = arith.constant 0 : index
    %c4_47 = arith.constant 4 : index
    %c0_48 = arith.constant 0 : index
    %c0_49 = arith.constant 0 : index
    %71 = vector.load %arg2[%c0_46, %c4_47, %c0_48, %c0_49] : memref<1x6x2x128xf32, #tpu.memory_space<vmem>>, vector<1x1x2x128xf32>
    %72 = vector.shape_cast %71 : vector<1x1x2x128xf32> to vector<2x128xf32>
    %73 = arith.subf %72, %22 : vector<2x128xf32>
    %74 = math.exp %73 : vector<2x128xf32>
    %75 = arith.addf %64, %74 : vector<2x128xf32>
    %c4_i32 = arith.constant 4 : i32
    %76 = vector.broadcast %c4_i32 : i32 to vector<2x128xi32>
    %77 = arith.cmpi eq, %5, %76 : vector<2x128xi32>
    %78 = arith.select %77, %73, %67 : vector<2x128xi1>, vector<2x128xf32>
    %79 = arith.select %77, %74, %68 : vector<2x128xi1>, vector<2x128xf32>
    %cst_50 = arith.constant 1.003900e+00 : f32
    %80 = vector.broadcast %cst_50 : f32 to vector<2x128xf32>
    %81 = arith.select %77, %80, %70 : vector<2x128xi1>, vector<2x128xf32>
    %c0_51 = arith.constant 0 : index
    %c5_52 = arith.constant 5 : index
    %c0_53 = arith.constant 0 : index
    %c0_54 = arith.constant 0 : index
    %82 = vector.load %arg2[%c0_51, %c5_52, %c0_53, %c0_54] : memref<1x6x2x128xf32, #tpu.memory_space<vmem>>, vector<1x1x2x128xf32>
    %83 = vector.shape_cast %82 : vector<1x1x2x128xf32> to vector<2x128xf32>
    %84 = arith.subf %83, %22 : vector<2x128xf32>
    %85 = math.exp %84 : vector<2x128xf32>
    %86 = arith.addf %75, %85 : vector<2x128xf32>
    %c5_i32 = arith.constant 5 : i32
    %87 = vector.broadcast %c5_i32 : i32 to vector<2x128xi32>
    %88 = arith.cmpi eq, %5, %87 : vector<2x128xi32>
    %89 = arith.select %88, %84, %78 : vector<2x128xi1>, vector<2x128xf32>
    %90 = arith.select %88, %85, %79 : vector<2x128xi1>, vector<2x128xf32>
    %cst_55 = arith.constant 0.856599986 : f32
    %91 = vector.broadcast %cst_55 : f32 to vector<2x128xf32>
    %92 = arith.select %88, %91, %81 : vector<2x128xi1>, vector<2x128xf32>
    %93 = math.log %86 : vector<2x128xf32>
    %94 = arith.subf %89, %93 : vector<2x128xf32>
    %95 = arith.divf %90, %86 : vector<2x128xf32>
    %cst_56 = arith.constant 0.000000e+00 : f32
    %96 = vector.broadcast %cst_56 : f32 to vector<2x128xf32>
    %97 = arith.subf %96, %92 : vector<2x128xf32>
    %98 = arith.mulf %97, %94 : vector<2x128xf32>
    %cst_57 = arith.constant 0.000000e+00 : f32
    %99 = vector.broadcast %cst_57 : f32 to vector<2x128xf32>
    %100 = arith.select %3, %99, %98 : vector<2x128xi1>, vector<2x128xf32>
    %c0_58 = arith.constant 0 : index
    %c0_59 = arith.constant 0 : index
    %c0_60 = arith.constant 0 : index
    %c0_61 = arith.constant 0 : index
    %101 = vector.load %arg4[%c0_58, %c0_59, %c0_60, %c0_61] : memref<1x1x2x128xf32, #tpu.memory_space<vmem>>, vector<1x1x2x128xf32>
    %102 = vector.shape_cast %101 : vector<1x1x2x128xf32> to vector<2x128xf32>
    %103 = vector.shape_cast %100 : vector<2x128xf32> to vector<1x1x2x128xf32>
    tpu.vector_store %arg4[%c0_58, %c0_59, %c0_60, %c0_61], %103 {strides = array<i32>} : memref<1x1x2x128xf32, #tpu.memory_space<vmem>>, vector<1x1x2x128xf32>,
    %c0_62 = arith.constant 0 : index
    %c0_63 = arith.constant 0 : index
    %c0_64 = arith.constant 0 : index
    %c0_65 = arith.constant 0 : index
    %104 = vector.load %arg5[%c0_62, %c0_63, %c0_64, %c0_65] : memref<1x1x2x128xf32, #tpu.memory_space<vmem>>, vector<1x1x2x128xf32>
    %105 = vector.shape_cast %104 : vector<1x1x2x128xf32> to vector<2x128xf32>
    %106 = vector.shape_cast %95 : vector<2x128xf32> to vector<1x1x2x128xf32>
    tpu.vector_store %arg5[%c0_62, %c0_63, %c0_64, %c0_65], %106 {strides = array<i32>} : memref<1x1x2x128xf32, #tpu.memory_space<vmem>>, vector<1x1x2x128xf32>,
    return
  }
  func.func @transform_0(%arg0: i32, %arg1: i32) -> (i32, i32, i32, i32) {
    %c0_i32 = arith.constant 0 : i32
    %c0_i32_0 = arith.constant 0 : i32
    %c0_i32_1 = arith.constant 0 : i32
    return %arg0, %c0_i32, %arg1, %c0_i32_0 : i32, i32, i32, i32
  }
  func.func @transform_1(%arg0: i32, %arg1: i32) -> (i32, i32, i32, i32) {
    %c0_i32 = arith.constant 0 : i32
    %c0_i32_0 = arith.constant 0 : i32
    %c0_i32_1 = arith.constant 0 : i32
    return %arg0, %c0_i32, %arg1, %c0_i32_0 : i32, i32, i32, i32
  }
  func.func @transform_2(%arg0: i32, %arg1: i32) -> (i32, i32, i32, i32) {
    %c0_i32 = arith.constant 0 : i32
    %c0_i32_0 = arith.constant 0 : i32
    %c0_i32_1 = arith.constant 0 : i32
    return %arg0, %c0_i32, %arg1, %c0_i32_0 : i32, i32, i32, i32
  }
  func.func @transform_3(%arg0: i32, %arg1: i32) -> (i32, i32, i32, i32) {
    %c0_i32 = arith.constant 0 : i32
    %c0_i32_0 = arith.constant 0 : i32
    %c0_i32_1 = arith.constant 0 : i32
    return %arg0, %c0_i32, %arg1, %c0_i32_0 : i32, i32, i32, i32
  }
}

</mosaic_0001>

<bundles_post_ra>
// kernel: ohem_cross_entropy.1
= control target key start
LH: loop header
LB: loop body
LE: loop exit
PB: predicated region body
PF: predicated region fallthrough
CT: control target
= control target key end

     0   :  { %s560_s12 = smov 0   ;;  %s562_s13 = smov 0   ;;  %s606_s0 = inlined_call_operand.vmem [shape: f32[2,6,2,128], index: 0, kind: input, shape index: {}]   ;;  %s607_s1 = inlined_call_operand.vmem [shape: s32[2,1,2,128], index: 1, kind: input, shape index: {}]   ;;  %s608_s2 = inlined_call_operand.vmem [shape: f32[2,1,2,128], index: 2, kind: output, shape index: {0}]   ;;  %s609_s3 = inlined_call_operand.vmem [shape: f32[2,1,2,128], index: 3, kind: output, shape index: {1}]  }
   0x1   :  { %s564_s14 = smov 0  }
   0x2 LB: > { %s26_s15 = sadd.s32 1, %s533_s13  ;;  %p461_p0 = scmp.ge.s32.totalorder %s537_s14, 1  ;;  %s537_s14 = sphi %s564_s14, %s14_s14   ;;  %s533_s13 = sphi %s562_s13, %s611_s13   ;;  %s529_s12 = sphi %s560_s12, %s610_s12  }
   0x3   : > { %p28_p1 = scmp.ge.s32.totalorder %s26_s15, 2  ;;  %p175_p2 = scmp.lt.s32.totalorder %s537_s14, 3 }
   0x5   : > { %s613_s15 = smov (%p28_p1, %s26_s15), 0  ;;  %p176_p3 = pnand %p461_p0, %p175_p2 }
   0x6   : > { %p218_p4 = scmp.lt.s32.totalorder (!%p176_p3), %s529_s12, 1  ;;  %v539_v32 = vmov (!%p176_p3), 0.0  }
   0x7   : > { %179 = sbr.rel (%p176_p3) target bundleno = 74 (0x4a), region = 28 }
   0xe   : > { %s615_s12 = smov (!%p218_p4, %s529_s12), 1 }
   0xf   : > { %s473_s16 = smul.u32 12, %s615_s12  ;;  %s581_s20 = sshll.u32 %s615_s12, 1 }
  0x10   : > { %s232_s23 = scalar_lea.vmem %s607_s1, %s581_s20  ;;  %s246_s26 = scalar_lea.vmem %s609_s3, %s581_s20 }
  0x11   : > { %s225_s19 = scalar_lea.vmem %s606_s0, %s473_s16  ;;  %v247_v22 = vld [vmem:[%s232_s23] sm:$0x3]  ;;  %s239_s29 = scalar_lea.vmem %s608_s2, %s581_s20 }
  0x12   : > { %v250_v0 = vld [vmem:[%s225_s19] sm:$0x3]  ;;  %v466_v1 = vld [vmem:[%s225_s19 + $0x2] sm:$0x3]  ;;  %v467_v3 = vld [vmem:[%s225_s19 + $0x4] sm:$0x3] }
  0x13   : > { %v253_v2 = vmax.f32 %v250_v0, %v466_v1  ;;  %v468_v4 = vld [vmem:[%s225_s19 + $0x6] sm:$0x3]  ;;  %v469_v6 = vld [vmem:[%s225_s19 + $0x8] sm:$0x3]  ;;  %v470_v8 = vld [vmem:[%s225_s19 + $0xa] sm:$0x3] }
  0x14   : > { %vm248_vm0 = vcmp.eq.s32.totalorder %v247_v22, 4294967295 }
  0x15   : > { %v256_v5 = vmax.f32 %v253_v2, %v467_v3  ;;  %v249_v24 = vsel %vm248_vm0, 0, %v247_v22 }
  0x16   : > { %vm270_vm1 = vcmp.eq.s32.totalorder %v249_v24, 0  ;;  %vm278_vm2 = vcmp.eq.s32.totalorder %v249_v24, 1  ;;  %vm286_vm3 = vcmp.eq.s32.totalorder %v249_v24, 2  ;;  %vm294_vm4 = vcmp.eq.s32.totalorder %v249_v24, 3 }
  0x17   : > { %v259_v7 = vmax.f32 %v256_v5, %v468_v4  ;;  %v273_v33 = vsel %vm270_vm1, 1.1405, %v539_v32  ;;  %vm302_vm5 = vcmp.eq.s32.totalorder %v249_v24, 4  ;;  %vm310_vm6 = vcmp.eq.s32.totalorder %v249_v24, 5 }
  0x18   : > { %v281_v38 = vsel %vm278_vm2, 0.9311, %v273_v33 }
  0x19   : > { %v262_v9 = vmax.f32 %v259_v7, %v469_v6  ;;  %v289_v43 = vsel %vm286_vm3, 1.0038, %v281_v38 }
  0x1a   : > { %v297_v46 = vsel %vm294_vm4, 1.1941, %v289_v43 }
  0x1b   : > { %v265_v10 = vmax.f32 %v262_v9, %v470_v8  ;;  %v305_v49 = vsel %vm302_vm5, 1.0039, %v297_v46 }
  0x1c   : > { %v313_v52 = vsel %vm310_vm6, 0.8566, %v305_v49 }
  0x1d   : > { %v266_v11 = vsub.f32 %v250_v0, %v265_v10  ;;  %v274_v12 = vsub.f32 %v466_v1, %v265_v10  ;;  %v282_v13 = vsub.f32 %v467_v3, %v265_v10  ;;  %v290_v14 = vsub.f32 %v468_v4, %v265_v10 }
  0x1e   : > { %v298_v15 = vsub.f32 %v469_v6, %v265_v10  ;;  %v306_v20 = vsub.f32 %v470_v8, %v265_v10  ;;  %v319_v58 = vsub.f32 0.0, %v313_v52 }
  0x1f   : > { %v267_v16 = vmul.f32 1.442695, %v266_v11  ;;  %v275_v17 = vmul.f32 1.442695, %v274_v12  ;;  %v283_v18 = vmul.f32 1.442695, %v282_v13 }
  0x20   : > { %v291_v19 = vmul.f32 1.442695, %v290_v14  ;;  %v299_v21 = vmul.f32 1.442695, %v298_v15  ;;  %v307_v23 = vmul.f32 1.442695, %v306_v20 }
  0x21   : > { %499 = vpow2.f32 %v267_v16  ;;  %v271_v37 = vsel %vm270_vm1, %v266_v11, 0.0 }
  0x22   : > { %501 = vpow2.f32 %v275_v17  ;;  %v279_v41 = vsel %vm278_vm2, %v274_v12, %v271_v37 }
  0x23   : > { %503 = vpow2.f32 %v283_v18  ;;  %v287_v45 = vsel %vm286_vm3, %v282_v13, %v279_v41 }
  0x24   : > { %505 = vpow2.f32 %v291_v19  ;;  %v295_v48 = vsel %vm294_vm4, %v290_v14, %v287_v45 }
  0x25   : > { %507 = vpow2.f32 %v299_v21  ;;  %v303_v51 = vsel %vm302_vm5, %v298_v15, %v295_v48 }
  0x26   : > { %509 = vpow2.f32 %v307_v23  ;;  %v311_v55 = vsel %vm310_vm6, %v306_v20, %v303_v51 }
  0x2b   : > { %v500_v25 = vpop.eup %499 }
  0x2c   : > { %v502_v26 = vpop.eup %501  ;;  %v272_v35 = vsel %vm270_vm1, %v500_v25, 0.0 }
  0x2d   : > { %v504_v27 = vpop.eup %503  ;;  %v277_v28 = vadd.f32 %v502_v26, %v500_v25  ;;  %v280_v40 = vsel %vm278_vm2, %v502_v26, %v272_v35 }
  0x2e   : > { %v506_v29 = vpop.eup %505  ;;  %v288_v44 = vsel %vm286_vm3, %v504_v27, %v280_v40 }
  0x2f   : > { %v285_v30 = vadd.f32 %v504_v27, %v277_v28  ;;  %v508_v31 = vpop.eup %507  ;;  %v296_v47 = vsel %vm294_vm4, %v506_v29, %v288_v44 }
  0x30   : > { %v510_v36 = vpop.eup %509  ;;  %v304_v50 = vsel %vm302_vm5, %v508_v31, %v296_v47 }
  0x31   : > { %v293_v34 = vadd.f32 %v506_v29, %v285_v30  ;;  %v312_v53 = vsel %vm310_vm6, %v510_v36, %v304_v50 }
  0x33   : > { %v301_v39 = vadd.f32 %v508_v31, %v293_v34 }
  0x35   : > { %v309_v42 = vadd.f32 %v510_v36, %v301_v39 }
  0x37   : > { %511 = vlog2.f32 %v309_v42 }
  0x38   : > { %513 = vrcp.f32 %v309_v42 }
  0x41   : > { %v512_v54 = vpop.eup %511 }
  0x42   : > { %v514_v56 = vpop.eup %513  ;;  %v315_v57 = vmul.f32 0.6931472, %v512_v54 }
  0x43   : > { %v318_v59 = vmul.f32 %v514_v56, %v312_v53 }
  0x44   : > { %v316_v60 = vsub.f32 %v311_v55, %v315_v57 }
  0x45   : > { %323 = vst [vmem:[%s246_s26] sm:$0x3] %v318_v59 }
  0x46   : > { %v320_v61 = vmul.f32 %v319_v58, %v316_v60 }
  0x48   : > { %v321_v62 = vsel %vm248_vm0, 0.0, %v320_v61 }
  0x49   : > { %322 = vst [vmem:[%s239_s29] sm:$0x3] %v321_v62 }
  0x4a PF: > { %s14_s14 = sadd.s32 1, %s537_s14   ;;  %s610_s12 = smov %s533_s13 }
  0x4b   : > { %p11_p5 = scmp.ge.s32.totalorder %s14_s14, 4   ;;  %s611_s13 = smov %s613_s15 }
  0x4d   :  { %13 = sbr.rel (!%p11_p5) target bundleno = 2 (0x2), region = 78 }

</bundles_post_ra>
